<compile_context>
chip_gen: v6e
topology: v6e:2x2x1
jax: 0.10.0
libtpu: 0.0.40
codegen_flags: <defaults>
</compile_context>

<pallas_src>
import jax
import jax.numpy as jnp
from jax import lax
from jax.experimental import pallas as pl
from jax.experimental.pallas import tpu as pltpu


def _attn_head_kernel(x_ref, wq_ref, wk_ref, wv_ref, wp_ref, b_ref,
                      o_ref, acc_ref):
    # x_ref  : (1, N, C)   one batch element (resident across the head axis)
    # wq_ref : (1, C, hd)  this head's Q weight slab (scale pre-folded)
    # wk_ref : (1, C, hd)  this head's K weight slab
    # wv_ref : (1, C, hd)  this head's V weight slab
    # wp_ref : (1, hd, C)  this head's rows of the output-projection weight
    # b_ref  : (1, C)      proj bias
    # o_ref  : (1, N, C)   output block for this batch element
    # acc_ref: (N, C) f32  VMEM accumulator over heads
    h = pl.program_id(1)
    num_heads = pl.num_programs(1)

    @pl.when(h == 0)
    def _init():
        acc_ref[...] = jnp.zeros_like(acc_ref)

    x = x_ref[0]                     # (N, C), storage dtype (f32 or bf16)
    cdt = x.dtype

    # Per-head Q/K/V projections (MXU, f32 accumulation).  Results are cast
    # back to the storage dtype so the following matmuls run at native rate.
    q = jnp.dot(x, wq_ref[0], preferred_element_type=jnp.float32).astype(cdt)
    k = jnp.dot(x, wk_ref[0], preferred_element_type=jnp.float32).astype(cdt)
    v = jnp.dot(x, wv_ref[0], preferred_element_type=jnp.float32).astype(cdt)

    # Scores: q @ k.T without materializing a transposed k.
    s = lax.dot_general(q, k, dimension_numbers=(((1,), (1,)), ((), ())),
                        preferred_element_type=jnp.float32)     # (N, N) f32

    # Softmax in f32; normalization deferred to the (N, hd) head output.
    s = s - jnp.max(s, axis=-1, keepdims=True)
    p = jnp.exp(s)
    denom = jnp.sum(p, axis=-1, keepdims=True)                  # (N, 1) f32

    o = jnp.dot(p.astype(cdt), v, preferred_element_type=jnp.float32)
    o = o / denom                                               # (N, hd) f32

    # This head's contribution to the output projection (lane-dense (N, C)).
    acc_ref[...] += jnp.dot(o.astype(cdt), wp_ref[0],
                            preferred_element_type=jnp.float32)

    @pl.when(h == num_heads - 1)
    def _finalize():
        y = acc_ref[...] + b_ref[...].astype(jnp.float32)       # broadcast bias
        o_ref[0] = y.astype(o_ref.dtype)


def attention_forward(x, w_qkv_t, w_proj_t, b_proj, *, num_heads):
    """x: (B, N, C); w_qkv_t: (C, 3C); w_proj_t: (C, C); b_proj: (C,)."""
    B, N, C = x.shape
    assert C % num_heads == 0
    hd = C // num_heads
    scale = hd ** (-0.5)

    # Split the fused qkv weight into per-head slabs, heads on the leading dim
    # (matches torch's reshape(B, N, 3, H, hd) column layout).
    wq = w_qkv_t[:, 0 * C:1 * C].reshape(C, num_heads, hd).transpose(1, 0, 2)
    wk = w_qkv_t[:, 1 * C:2 * C].reshape(C, num_heads, hd).transpose(1, 0, 2)
    wv = w_qkv_t[:, 2 * C:3 * C].reshape(C, num_heads, hd).transpose(1, 0, 2)
    # Fold the softmax scale into the Q weights (removes a per-head VPU mul).
    wq = wq * jnp.asarray(scale, wq.dtype)
    # Per-head rows of the output projection: y = sum_h o_h @ wp[h].
    wp = w_proj_t.reshape(num_heads, hd, C)
    b2d = b_proj.reshape(1, C)

    return pl.pallas_call(
        _attn_head_kernel,
        out_shape=jax.ShapeDtypeStruct((B, N, C), x.dtype),
        grid_spec=pltpu.PrefetchScalarGridSpec(
            num_scalar_prefetch=0,
            grid=(B, num_heads),
            in_specs=[
                pl.BlockSpec((1, N, C), lambda b, h: (b, 0, 0)),   # x
                pl.BlockSpec((1, C, hd), lambda b, h: (h, 0, 0)),  # Wq[h]
                pl.BlockSpec((1, C, hd), lambda b, h: (h, 0, 0)),  # Wk[h]
                pl.BlockSpec((1, C, hd), lambda b, h: (h, 0, 0)),  # Wv[h]
                pl.BlockSpec((1, hd, C), lambda b, h: (h, 0, 0)),  # Wproj[h]
                pl.BlockSpec((1, C), lambda b, h: (0, 0)),         # proj bias
            ],
            out_specs=pl.BlockSpec((1, N, C), lambda b, h: (b, 0, 0)),
            scratch_shapes=[pltpu.VMEM((N, C), jnp.float32)],
        ),
        compiler_params=pltpu.CompilerParams(
            dimension_semantics=("parallel", "arbitrary")),
    )(x, wq, wk, wv, wp, b2d)


def _reference(x, w_qkv_t, w_proj_t, b_proj, num_heads):
    B, N, C = x.shape
    hd = C // num_heads
    scale = hd ** (-0.5)
    qkv = x @ w_qkv_t                                       # (B, N, 3C)
    qkv = qkv.reshape(B, N, 3, num_heads, hd).transpose(2, 0, 3, 1, 4)
    q, k, v = qkv[0], qkv[1], qkv[2]                        # (B, H, N, hd)
    attn = jax.nn.softmax((q * scale) @ jnp.swapaxes(k, -2, -1), axis=-1)
    out = attn @ v                                          # (B, H, N, hd)
    out = out.transpose(0, 2, 1, 3).reshape(B, N, C)
    return out @ w_proj_t + b_proj


if __name__ == "__main__":
    # Small deterministic problem: B=2, N=8 (seq), C=32 (dim), 8 heads, hd=4.
    B, N, C, H = 2, 8, 32, 8
    key = jax.random.PRNGKey(0)
    kx, kqkv, kp, kb = jax.random.split(key, 4)

    x = jax.random.normal(kx, (B, N, C), dtype=jnp.float32)
    # torch.nn.Linear weights are (out, in); we store the transposed (in, out).
    w_qkv_t = jax.random.normal(kqkv, (C, 3 * C), dtype=jnp.float32) * 0.05
    w_proj_t = jax.random.normal(kp, (C, C), dtype=jnp.float32) * 0.05
    b_proj = jax.random.normal(kb, (C,), dtype=jnp.float32) * 0.05

    out = attention_forward(x, w_qkv_t, w_proj_t, b_proj, num_heads=H)
    out = jax.block_until_ready(out)

    ref = _reference(x, w_qkv_t, w_proj_t, b_proj, H)
    assert out.shape == (B, N, C)
    assert jnp.allclose(out, ref, atol=1e-4, rtol=1e-4), "mismatch vs reference"

    print("KERNEL_OK")
</pallas_src>

<mosaic_0001>
module attributes {stable_mosaic.version = 11 : i64} {
  func.func @_attn_head_kernel(%arg0: i32, %arg1: i32, %arg2: memref<1x8x32xf32, #tpu.memory_space<vmem>>, %arg3: memref<1x32x4xf32, #tpu.memory_space<vmem>>, %arg4: memref<1x32x4xf32, #tpu.memory_space<vmem>>, %arg5: memref<1x32x4xf32, #tpu.memory_space<vmem>>, %arg6: memref<1x4x32xf32, #tpu.memory_space<vmem>>, %arg7: memref<1x32xf32, #tpu.memory_space<vmem>>, %arg8: memref<1x8x32xf32, #tpu.memory_space<vmem>>, %arg9: memref<8x32xf32, #tpu.memory_space<vmem>>) attributes {dimension_semantics = [#tpu.dimension_semantics<parallel>, #tpu.dimension_semantics<arbitrary>], iteration_bounds = array<i64: 2, 8>, scalar_prefetch = 0 : i64, scratch_operands = 1 : i64, tpu.core_type = #tpu.core_type<tc>, window_params = [{transform_indices = @transform_0, window_bounds = array<i64: 1, 8, 32>}, {transform_indices = @transform_1, window_bounds = array<i64: 1, 32, 4>}, {transform_indices = @transform_2, window_bounds = array<i64: 1, 32, 4>}, {transform_indices = @transform_3, window_bounds = array<i64: 1, 32, 4>}, {transform_indices = @transform_4, window_bounds = array<i64: 1, 4, 32>}, {pipeline_mode = #tpu.pipeline_mode<synchronous>, transform_indices = @transform_5, window_bounds = array<i64: 1, 32>}, {transform_indices = @transform_6, window_bounds = array<i64: 1, 8, 32>}]} {
    %c0_i32 = arith.constant 0 : i32
    %0 = arith.cmpi eq, %arg1, %c0_i32 : i32
    %1 = arith.extui %0 : i1 to i32
    %c0_i32_0 = arith.constant 0 : i32
    %2 = arith.cmpi ne, %1, %c0_i32_0 : i32
    scf.if %2 {
      %cst_27 = arith.constant 0.000000e+00 : f32
      %34 = vector.broadcast %cst_27 : f32 to vector<8x32xf32>
      %c0_28 = arith.constant 0 : index
      %c0_29 = arith.constant 0 : index
      %35 = vector.load %arg9[%c0_28, %c0_29] : memref<8x32xf32, #tpu.memory_space<vmem>>, vector<8x32xf32>
      tpu.vector_store %arg9[%c0_28, %c0_29], %34 {strides = array<i32>} : memref<8x32xf32, #tpu.memory_space<vmem>>, vector<8x32xf32>,
    } else {
    }
    %c0 = arith.constant 0 : index
    %c0_1 = arith.constant 0 : index
    %c0_2 = arith.constant 0 : index
    %3 = vector.load %arg2[%c0, %c0_1, %c0_2] : memref<1x8x32xf32, #tpu.memory_space<vmem>>, vector<1x8x32xf32>
    %4 = vector.shape_cast %3 : vector<1x8x32xf32> to vector<8x32xf32>
    %c0_3 = arith.constant 0 : index
    %c0_4 = arith.constant 0 : index
    %c0_5 = arith.constant 0 : index
    %5 = vector.load %arg3[%c0_3, %c0_4, %c0_5] : memref<1x32x4xf32, #tpu.memory_space<vmem>>, vector<1x32x4xf32>
    %6 = vector.shape_cast %5 : vector<1x32x4xf32> to vector<32x4xf32>
    %cst = arith.constant dense<0.000000e+00> : vector<8x4xf32>
    %7 = tpu.matmul %4, %6, %cst {dimension_numbers = #tpu.dot_dimension_numbers<[1], [0], [0], [1], [0, 0, 1, 1], [], []>} : vector<8x32xf32>, vector<32x4xf32>, vector<8x4xf32> -> vector<8x4xf32>
    %c0_6 = arith.constant 0 : index
    %c0_7 = arith.constant 0 : index
    %c0_8 = arith.constant 0 : index
    %8 = vector.load %arg4[%c0_6, %c0_7, %c0_8] : memref<1x32x4xf32, #tpu.memory_space<vmem>>, vector<1x32x4xf32>
    %9 = vector.shape_cast %8 : vector<1x32x4xf32> to vector<32x4xf32>
    %cst_9 = arith.constant dense<0.000000e+00> : vector<8x4xf32>
    %10 = tpu.matmul %4, %9, %cst_9 {dimension_numbers = #tpu.dot_dimension_numbers<[1], [0], [0], [1], [0, 0, 1, 1], [], []>} : vector<8x32xf32>, vector<32x4xf32>, vector<8x4xf32> -> vector<8x4xf32>
    %c0_10 = arith.constant 0 : index
    %c0_11 = arith.constant 0 : index
    %c0_12 = arith.constant 0 : index
    %11 = vector.load %arg5[%c0_10, %c0_11, %c0_12] : memref<1x32x4xf32, #tpu.memory_space<vmem>>, vector<1x32x4xf32>
    %12 = vector.shape_cast %11 : vector<1x32x4xf32> to vector<32x4xf32>
    %cst_13 = arith.constant dense<0.000000e+00> : vector<8x4xf32>
    %13 = tpu.matmul %4, %12, %cst_13 {dimension_numbers = #tpu.dot_dimension_numbers<[1], [0], [0], [1], [0, 0, 1, 1], [], []>} : vector<8x32xf32>, vector<32x4xf32>, vector<8x4xf32> -> vector<8x4xf32>
    %cst_14 = arith.constant dense<0.000000e+00> : vector<8x8xf32>
    %14 = tpu.matmul %7, %10, %cst_14 {dimension_numbers = #tpu.dot_dimension_numbers<[1], [1], [0], [0], [0, 0, 1, 0], [], []>} : vector<8x4xf32>, vector<8x4xf32>, vector<8x8xf32> -> vector<8x8xf32>
    %cst_15 = arith.constant dense<0xFF800000> : vector<8xf32>
    %15 = vector.multi_reduction <maximumf>, %14, %cst_15 [1] : vector<8x8xf32> to vector<8xf32>
    %16 = vector.shape_cast %15 : vector<8xf32> to vector<8x1xf32>
    %17 = vector.broadcast %16 : vector<8x1xf32> to vector<8x8xf32>
    %18 = arith.subf %14, %17 : vector<8x8xf32>
    %19 = math.exp %18 : vector<8x8xf32>
    %cst_16 = arith.constant dense<0.000000e+00> : vector<8xf32>
    %20 = vector.multi_reduction <add>, %19, %cst_16 [1] : vector<8x8xf32> to vector<8xf32>
    %21 = vector.shape_cast %20 : vector<8xf32> to vector<8x1xf32>
    %cst_17 = arith.constant dense<0.000000e+00> : vector<8x4xf32>
    %22 = tpu.matmul %19, %13, %cst_17 {dimension_numbers = #tpu.dot_dimension_numbers<[1], [0], [0], [1], [0, 0, 1, 1], [], []>} : vector<8x8xf32>, vector<8x4xf32>, vector<8x4xf32> -> vector<8x4xf32>
    %23 = vector.broadcast %21 : vector<8x1xf32> to vector<8x4xf32>
    %24 = arith.divf %22, %23 : vector<8x4xf32>
    %c0_18 = arith.constant 0 : index
    %c0_19 = arith.constant 0 : index
    %25 = vector.load %arg9[%c0_18, %c0_19] : memref<8x32xf32, #tpu.memory_space<vmem>>, vector<8x32xf32>
    %c0_20 = arith.constant 0 : index
    %c0_21 = arith.constant 0 : index
    %c0_22 = arith.constant 0 : index
    %26 = vector.load %arg6[%c0_20, %c0_21, %c0_22] : memref<1x4x32xf32, #tpu.memory_space<vmem>>, vector<1x4x32xf32>
    %27 = vector.shape_cast %26 : vector<1x4x32xf32> to vector<4x32xf32>
    %cst_23 = arith.constant dense<0.000000e+00> : vector<8x32xf32>
    %28 = tpu.matmul %24, %27, %cst_23 {dimension_numbers = #tpu.dot_dimension_numbers<[1], [0], [0], [1], [0, 0, 1, 1], [], []>} : vector<8x4xf32>, vector<4x32xf32>, vector<8x32xf32> -> vector<8x32xf32>
    %29 = arith.addf %25, %28 : vector<8x32xf32>
    %c0_24 = arith.constant 0 : index
    %c0_25 = arith.constant 0 : index
    %30 = vector.load %arg9[%c0_24, %c0_25] : memref<8x32xf32, #tpu.memory_space<vmem>>, vector<8x32xf32>
    tpu.vector_store %arg9[%c0_24, %c0_25], %29 {strides = array<i32>} : memref<8x32xf32, #tpu.memory_space<vmem>>, vector<8x32xf32>,
    %c7_i32 = arith.constant 7 : i32
    %31 = arith.cmpi eq, %arg1, %c7_i32 : i32
    %32 = arith.extui %31 : i1 to i32
    %c0_i32_26 = arith.constant 0 : i32
    %33 = arith.cmpi ne, %32, %c0_i32_26 : i32
    scf.if %33 {
      %c0_27 = arith.constant 0 : index
      %c0_28 = arith.constant 0 : index
      %34 = vector.load %arg9[%c0_27, %c0_28] : memref<8x32xf32, #tpu.memory_space<vmem>>, vector<8x32xf32>
      %c0_29 = arith.constant 0 : index
      %c0_30 = arith.constant 0 : index
      %35 = vector.load %arg7[%c0_29, %c0_30] : memref<1x32xf32, #tpu.memory_space<vmem>>, vector<1x32xf32>
      %36 = vector.broadcast %35 : vector<1x32xf32> to vector<8x32xf32>
      %37 = arith.addf %34, %36 : vector<8x32xf32>
      %c0_31 = arith.constant 0 : index
      %c0_32 = arith.constant 0 : index
      %c0_33 = arith.constant 0 : index
      %38 = vector.load %arg8[%c0_31, %c0_32, %c0_33] : memref<1x8x32xf32, #tpu.memory_space<vmem>>, vector<1x8x32xf32>
      %39 = vector.shape_cast %38 : vector<1x8x32xf32> to vector<8x32xf32>
      %40 = vector.shape_cast %37 : vector<8x32xf32> to vector<1x8x32xf32>
      tpu.vector_store %arg8[%c0_31, %c0_32, %c0_33], %40 {strides = array<i32>} : memref<1x8x32xf32, #tpu.memory_space<vmem>>, vector<1x8x32xf32>,
    } else {
    }
    return
  }
  func.func @transform_0(%arg0: i32, %arg1: i32) -> (i32, i32, i32) {
    %c0_i32 = arith.constant 0 : i32
    %c0_i32_0 = arith.constant 0 : i32
    %c0_i32_1 = arith.constant 0 : i32
    return %arg0, %c0_i32, %c0_i32_0 : i32, i32, i32
  }
  func.func @transform_1(%arg0: i32, %arg1: i32) -> (i32, i32, i32) {
    %c0_i32 = arith.constant 0 : i32
    %c0_i32_0 = arith.constant 0 : i32
    %c0_i32_1 = arith.constant 0 : i32
    return %arg1, %c0_i32, %c0_i32_0 : i32, i32, i32
  }
  func.func @transform_2(%arg0: i32, %arg1: i32) -> (i32, i32, i32) {
    %c0_i32 = arith.constant 0 : i32
    %c0_i32_0 = arith.constant 0 : i32
    %c0_i32_1 = arith.constant 0 : i32
    return %arg1, %c0_i32, %c0_i32_0 : i32, i32, i32
  }
  func.func @transform_3(%arg0: i32, %arg1: i32) -> (i32, i32, i32) {
    %c0_i32 = arith.constant 0 : i32
    %c0_i32_0 = arith.constant 0 : i32
    %c0_i32_1 = arith.constant 0 : i32
    return %arg1, %c0_i32, %c0_i32_0 : i32, i32, i32
  }
  func.func @transform_4(%arg0: i32, %arg1: i32) -> (i32, i32, i32) {
    %c0_i32 = arith.constant 0 : i32
    %c0_i32_0 = arith.constant 0 : i32
    %c0_i32_1 = arith.constant 0 : i32
    return %arg1, %c0_i32, %c0_i32_0 : i32, i32, i32
  }
  func.func @transform_5(%arg0: i32, %arg1: i32) -> (i32, i32) {
    %c0_i32 = arith.constant 0 : i32
    %c0_i32_0 = arith.constant 0 : i32
    %c0_i32_1 = arith.constant 0 : i32
    return %c0_i32, %c0_i32_0 : i32, i32
  }
  func.func @transform_6(%arg0: i32, %arg1: i32) -> (i32, i32, i32) {
    %c0_i32 = arith.constant 0 : i32
    %c0_i32_0 = arith.constant 0 : i32
    %c0_i32_1 = arith.constant 0 : i32
    return %arg0, %c0_i32, %c0_i32_0 : i32, i32, i32
  }
}

</mosaic_0001>

<bundles_post_ra>
// kernel: tpu_custom_call.1
= control target key start
LH: loop header
LB: loop body
LE: loop exit
PB: predicated region body
PF: predicated region fallthrough
CT: control target
= control target key end

     0   :  { %11 = vsyncpa [#allocation4], 0  ;;  %s1451_s0 = inlined_call_operand.vmem [shape: f32[2,8,32], index: 0, kind: input, shape index: {}]   ;;  %s1452_s1 = inlined_call_operand.vmem [shape: f32[8,32,4], index: 1, kind: input, shape index: {}]   ;;  %s1453_s2 = inlined_call_operand.vmem [shape: f32[8,32,4], index: 2, kind: input, shape index: {}]   ;;  %s1454_s3 = inlined_call_operand.vmem [shape: f32[8,32,4], index: 3, kind: input, shape index: {}]   ;;  %s1455_s4 = inlined_call_operand.vmem [shape: f32[8,4,32], index: 4, kind: input, shape index: {}]   ;;  %s1456_s5 = inlined_call_operand.vmem [shape: f32[1,32], index: 5, kind: input, shape index: {}]   ;;  %s1457_s6 = inlined_call_operand.hbm [shape: f32[2,8,32], index: 6, kind: output, shape index: {}]  }
   0x1   :  { %13 = vsyncpa [#allocation4 + $0x1], 0  ;;  %s1270_s21 = smov 0   ;;  %s1272_s22 = smov 0  }
   0x2   :  { %s1274_s23 = smov 0   ;;  %s1276_s24 = smov 0  }
   0x3   :  { %s1278_s25 = smov 0   ;;  %s1280_s26 = smov 0  }
   0x4   :  { %s1282_s27 = smov 0   ;;  %s1284_s28 = smov 0  }
   0x5 LB: > { %1464 = sst [smem:[#allocation6_spill]] %s1209_s23  ;;  %s958_s29 = sadd.s32 4294967295, %s1229_s28   ;;  %s1229_s28 = sphi %s1284_s28, %s19_s28   ;;  %s1225_s27 = sphi %s1282_s27, %s1483_s27   ;;  %s1221_s26 = sphi %s1280_s26, %s1479_s26   ;;  %s1217_s25 = sphi %s1278_s25, %s1478_s25   ;;  %s1213_s24 = sphi %s1276_s24, %s1477_s24   ;;  %s1209_s23 = sphi %s1274_s23, %s1476_s23   ;;  %s1205_s22 = sphi %s1272_s22, %s1482_s22   ;;  %s1201_s21 = sphi %s1270_s21, %s1481_s21  }
   0x6   : > { %1465 = sst [smem:[#allocation7_spill]] %s1221_s26  ;;  %s959_s30 = sadd.s32 4294967294, %s1229_s28  }
   0x7   : > { %1466 = sst [smem:[#allocation8_spill]] %s1225_s27  ;;  %s28_s7 = sadd.s32 1, %s1221_s26 }
   0x8   : > { %p29_p0 = scmp.ge.s32.totalorder %s28_s7, 8  ;;  %s31_s8 = sadd.s32 1, %s1225_s27 }
   0x9   : > { %p199_p1 = scmp.ne.s32.totalorder %s1209_s23, %s1205_s22  ;;  %p200_p2 = scmp.eq.s32.totalorder %s958_s29, 15 }
   0xa   : > { %s1485_s7 = smov (%p29_p0, %s28_s7), 0  ;;  %s1487_s8 = smov (!%p29_p0, %s31_s8), %s1225_s27 }
   0xb   : > { %1467 = sst [smem:[#allocation9_spill]] %s1485_s7  ;;  %p1319_p3 = por %p200_p2, %p199_p1 }
   0xc   : > { %p205_p4 = scmp.ne.s32.totalorder %s1205_s22, %s1201_s21  ;;  %p33_p5 = scmp.ge.s32.totalorder %s1487_s8, 2 }
   0xd   : > { %p206_p6 = scmp.eq.s32.totalorder %s959_s30, 15  ;;  %p962_p7 = scmp.ge.s32.totalorder %s1229_s28, 1 }
   0xe   : > { %p265_p8 = scmp.lt.s32.totalorder %s1229_s28, 17  ;;  %s1489_s8 = smov (%p33_p5, %s1487_s8), 0 }
   0xf   : > { %1469 = sst [smem:[#allocation10_spill]] %s1489_s8  ;;  %p1329_p9 = por %p206_p6, %p205_p4 }
  0x10   : > { %p266_p10 = pnand %p962_p7, %p265_p8  ;;  %s186_s11 = ssub.s32 %s1225_s27, %s1489_s8 }
  0x11   : > { %s1470_s10 = scalar_select %p1329_p9, 1, 0 }
  0x12   : > { %s189_s12 = sadd.s32 1, %s1209_s23  ;;  %p187_p11 = scmp.eq.s32.totalorder %s186_s11, 0 }
  0x13   : > { %1471 = sst [smem:[#allocation11_spill]] %s1470_s10  ;;  %269 = sbr.rel (%p266_p10) target bundleno = 1017 (0x3f9), region = 44 }
  0x14   : > { %s1337_s13 = scalar_select %p187_p11, %s1209_s23, %s189_s12  }
  0x15   : > { %s1460_s14 = sand.u32 (!%p266_p10), 1, %s1205_s22   ;;  %p313_p12 = scmp.lt.s32.totalorder (!%p266_p10), %s1217_s25, 1 }
  0x16   : > { %1472 = sst [smem:[#allocation12_spill]] %s1337_s13  ;;  %s1343_s15 = sshll.u32 (!%p266_p10), %s1460_s14, 3 }
  0x17   : > { %p317_p13 = scmp.lt.s32.totalorder (!%p266_p10), %s1213_s24, 7  ;;  %s312_s20 = scalar_lea.vmem (!%p266_p10), [#allocation3], %s1343_s15 }
  0x18   : > { %s314_s16 = scalar_select %p313_p12, %s1217_s25, 1 }
  0x19   : > { %s318_s17 = scalar_select %p317_p13, %s1213_s24, 7 }
  0x1a   : > { %s964_s18 = sshll.u32 %s314_s16, 3  ;;  %p972_p0 = scmp.ne.s32.totalorder %s1213_s24, 0 }
  0x1b   : > { %s1351_s29 = scalar_lea.vmem %s1451_s0, %s964_s18  ;;  %s987_s30 = sshll.u32 %s318_s17, 5 }
  0x1c   : > { %s1356_s8 = scalar_lea.vmem %s1452_s1, %s987_s30  ;;  %s326_s14 = scalar_lea.vmem %s1453_s2, %s987_s30 }
  0x1d   : > { %s1364_s23 = scalar_lea.vmem %s1454_s3, %s987_s30  ;;  %s971_s16 = sshll.u32 %s318_s17, 2 }
  0x1e   : > { %s1369_s18 = scalar_lea.vmem %s1455_s4, %s971_s16  ;;  %339 = sbr.rel (%p972_p0) target bundleno = 37 (0x25), region = 48 }
  0x23   : > { %vm340_vm0 = vcmask 261120   ;;  %v1231_v0 = vmov 0.0  }
  0x24   : > { %341 = vst.msk [vmem:[#allocation2] sm:$0xff] %vm340_vm0, %v1231_v0 }
  0x25 PF: > { %v424_v1 = vld [vmem:[%s326_s14 + $0x18] sm:$0xff]  ;;  %v1232_v3 = vmov 0.0   ;;  %v423_v4 = vld [vmem:[%s326_s14 + $0x10] sm:$0xff]  ;;  %v422_v6 = vld [vmem:[%s326_s14 + $0x8] sm:$0xff]  ;;  %vm347_vm1 = vcmask 261120   ;;  %vm1233_vm2 = vmmov 0  }
  0x26   : > { %v346_v2 = vld [vmem:[%s1356_s8 + $0x18] sm:$0xff]  ;;  %1022 = vmatprep.subr.mxu1 %v1232_v3  ;;  %1011 = vmatprep.subr.mxu0 %v1232_v3  ;;  %v345_v5 = vld [vmem:[%s1356_s8 + $0x10] sm:$0xff]  ;;  %v344_v7 = vld [vmem:[%s1356_s8 + $0x8] sm:$0xff]  ;;  %vm569_vm3 = vcmask 31744   ;;  %vm646_vm4 = vcmask 64512   ;;  %vm736_vm5 = vcmask 1043456  }
  0x27   : > { %1023 = vmatpush3.msra.mxu1 %v424_v1  ;;  %1012 = vmatpush3.msra.mxu0 %v346_v2  ;;  %v421_v8 = vld [vmem:[%s326_s14] sm:$0xff]  ;;  %v498_v11 = vld [vmem:[%s1364_s23 + $0x18] sm:$0xff]  ;;  %v497_v12 = vld [vmem:[%s1364_s23 + $0x10] sm:$0xff]  ;;  %p981_p1 = scmp.ne.s32.totalorder %s1213_s24, 7 }
  0x28   : > { %1024 = vmatprep.subr.mxu1 %v1232_v3  ;;  %1013 = vmatprep.subr.mxu0 %v1232_v3  ;;  %v342_v9 = vld [vmem:[%s1351_s29] sm:$0xff]  ;;  %v496_v13 = vld [vmem:[%s1364_s23 + $0x8] sm:$0xff] }
  0x29   : > { %1025 = vmatpush3.msra.mxu1 %v423_v4  ;;  %1014 = vmatpush3.msra.mxu0 %v345_v5  ;;  %v343_v10 = vld [vmem:[%s1356_s8] sm:$0xff] }
  0x2a   : > { %1026 = vmatprep.subr.mxu1 %v1232_v3  ;;  %1015 = vmatprep.subr.mxu0 %v1232_v3  ;;  %v495_v14 = vld [vmem:[%s1364_s23] sm:$0xff] }
  0x2b   : > { %1027 = vmatpush3.msra.mxu1 %v422_v6  ;;  %1016 = vmatpush3.msra.mxu0 %v344_v7  ;;  %v732_v29 = vld [vmem:[%s1369_s18] sm:$0xf] }
  0x2c   : > { %1028 = vmatprep.subr.mxu1 %v1232_v3  ;;  %1030 = vmatprep.mubr.msk.f32.mxu1 %vm1233_vm2, %v1232_v3  ;;  %v731_v35 = vld [vmem:[#allocation2] sm:$0xff] }
  0x2d   : > { %1029 = vmatpush3.msra.mxu1 %v421_v8  ;;  %1017 = vmatprep.subr.mxu0 %v1232_v3 }
  0x2e   : > { %1031 = vmatmul.mubr.msk.f32.vlgmr.msra.gmra.mxu1 %vm347_vm1, %v342_v9  ;;  %1018 = vmatpush3.msra.mxu0 %v343_v10 }
  0x2f   : > { %1019 = vmatprep.mubr.msk.f32.mxu0 %vm1233_vm2, %v1232_v3  ;;  %1044 = vmatprep.subr.mxu1 %v1232_v3 }
  0x30   : > { %1020 = vmatmul.mubr.msk.f32.vlgmr.msra.gmra.mxu0 %vm347_vm1, %v342_v9  ;;  %1046 = vmatprep.mubr.msk.f32.mxu1 %vm1233_vm2, %v1232_v3 }
  0x31   : > { %1033 = vmatprep.subr.mxu0 %v1232_v3  ;;  %1041 = vmatprep.mubr.msk.f32.mxu0 %vm1233_vm2, %v1232_v3 }
  0x32   : > { %1034 = vmatpush3.msra.mxu0 %v498_v11 }
  0x33   : > { %1035 = vmatprep.subr.mxu0 %v1232_v3 }
  0x34   : > { %1036 = vmatpush3.msra.mxu0 %v497_v12 }
  0x35   : > { %1037 = vmatprep.subr.mxu0 %v1232_v3 }
  0x36   : > { %1038 = vmatpush3.msra.mxu0 %v496_v13 }
  0x37   : > { %1039 = vmatprep.subr.mxu0 %v1232_v3 }
  0x38   : > { %1040 = vmatpush3.msra.mxu0 %v495_v14 }
  0x39   : > { %1042 = vmatmul.mubr.msk.f32.vlgmr.msra.gmra.mxu0 %vm347_vm1, %v342_v9  ;;  %1054 = vmatprep.subr.mxu0 %v1232_v3 }
  0x3a   : > { %1056 = vmatprep.mubr.msk.f32.mxu0 %vm1233_vm2, %v1232_v3  ;;  %1055 = vmatpush3.msk.msra.mxu0 %vm736_vm5, %v732_v29 }
  0xee   : > { %v491_v15 = vpop.f32.mrf.mxu1 }
  0xef   : > { %1045 = vmatpush3.xpose.msk.msra.mxu1 %vm569_vm3, %v491_v15 }
  0xf0   : > { %v417_v16 = vpop.f32.mrf.mxu0  ;;  %v1032_v17 = vpop.f32.mrf.mxu1  ;;  %1049 = vmatprep.subr.mxu1 %v1232_v3 }
  0xf2   : > { %v1021_v18 = vpop.f32.mrf.mxu0  ;;  %1047 = vmatmul.mubr.msk.f32.vlgmr.msra.gmra.mxu1 %vm569_vm3, %v417_v16 }
  0xf3   : > { %1051 = vmatprep.mubr.msk.f32.mxu1 %vm1233_vm2, %v1232_v3 }
  0xf9   : > { %v565_v22 = vpop.f32.mrf.mxu0 }
  0xfa   : > { %1050 = vmatpush3.msra.mxu1 %v565_v22 }
  0xfb   : > { %v1043_v23 = vpop.f32.mrf.mxu0 }
 0x1b2   : > { %v642_v19 = vpop.f32.mrf.mxu1 }
 0x1b3   : > { %v647_v20 = vsel %vm646_vm4, %v642_v19, -inf }
 0x1b4   : > { %648 = vmax.xlane.f32.xlu0 %v647_v20  ;;  %v1048_v21 = vpop.f32.mrf.mxu1 }
 0x23d   : > { %v649_v24 = vpop.xlane.xlu0 %648 }
 0x23e   : > { %v650_v25 = vsub.f32 %v642_v19, %v649_v24 }
 0x240   : > { %v651_v26 = vmul.f32 1.442695, %v650_v25 }
 0x242   : > { %1133 = vpow2.f32 %v651_v26 }
 0x24f   : > { %v1134_v27 = vpop.eup %1133 }
 0x250   : > { %1052 = vmatmul.mubr.msk.f32.vlgmr.msra.gmra.mxu1 %vm646_vm4, %v1134_v27  ;;  %v653_v28 = vsel %vm646_vm4, %v1134_v27, 0.0 }
 0x251   : > { %654 = vadd.xlane.f32.xlu0 %v653_v28 }
 0x2da   : > { %v655_v30 = vpop.xlane.xlu0 %654 }
 0x2db   : > { %1135 = vrcp.f32 %v655_v30 }
 0x2e8   : > { %v1136_v31 = vpop.eup %1135 }
 0x310   : > { %v725_v32 = vpop.f32.mrf.mxu1 }
 0x311   : > { %v730_v33 = vmul.f32 %v1136_v31, %v725_v32 }
 0x312   : > { %v1053_v34 = vpop.f32.mrf.mxu1 }
 0x313   : > { %1057 = vmatmul.mubr.msk.f32.vlgmr.msra.gmra.mxu0 %vm569_vm3, %v730_v33 }
 0x3d2   : > { %815 = sbr.rel (%p981_p1) target bundleno = 993 (0x3e1), region = 52 }
 0x3d3   : > { %v806_v36 = vpop.f32.mrf.mxu0 }
 0x3d4   : > { %v810_v37 = vadd.f32 %v806_v36, %v731_v35 }
 0x3d5   : > { %v1058_v38 = vpop.f32.mrf.mxu0 }
 0x3d6   : > { %811 = vst.msk [vmem:[#allocation2] sm:$0xff] %vm347_vm1, %v810_v37 }
 0x3d7   : > { %v982_v40 = vld [vmem:[%s1456_s5] ss:$0 sm:$0xff] }
 0x3dd   : > { %v816_v39 = vld [vmem:[#allocation2] sm:$0xff] }
 0x3de   : > { %v824_v41 = vadd.f32 %v982_v40, %v816_v39 }
 0x3e0   : > { %825 = vst.msk [vmem:[%s312_s20] sm:$0xff] %vm347_vm1, %v824_v41 }
 0x3e1 PF: > { %s984_s27 = sshll.u32 %s1217_s25, 7  ;;  %s840_s10 = sshll.u32 %s312_s20, 4  ;;  %s841_s10 = int_to_ptr.vmem [resolvable:$true] %s840_s10 }
 0x3e2   : > { %s838_s24 = scalar_lea.hbm %s1457_s6, %s984_s27  ;;  %s1473_s13 = sand.u32 1, %s1205_s22  }
 0x3e3   : > { %s827_s14 = scalar_lea.sflag [#allocation4], %s1473_s13  ;;  %s1137_s17 = scalar_lea.vmem %s841_s10, 128 }
 0x3e4   : > { %p1138_p2 = scmp.ne.s32.totalorder %s841_s10, %s1137_s17  ;;  %s1234_s29 = smov [#allocation3]  }
 0x3e5   : > { %s1141_s30 = sshll.u32 %s1234_s29, 4  ;;  %s1142_s30 = int_to_ptr.vmem [resolvable:$false] %s1141_s30 }
 0x3e6   : > { %p1139_p4 = pnand %p1138_p2, %p1319_p3  ;;  %s1143_s11 = scalar_lea.vmem %s1142_s30, 256 }
 0x3e7   : > { %p1144_p6 = scmp.lt.s32.totalorder %s841_s10, %s1142_s30  ;;  %p1145_p7 = scmp.lt.s32.totalorder %s1143_s11, %s1137_s17 }
 0x3e8   : > { %p1140_p5 = pneg %p1139_p4 }
 0x3e9   : > { %p1146_p8 = por %p1145_p7, %p1144_p6 }
 0x3eb   : > { %p1147_p10 = pnand %p1146_p8, %p1140_p5 }
 0x3ed   : > { %1150 = shalt.err (!%p1147_p10)
}
 0x3ee   : > { %s1151_s25 = scalar_lea.hbm %s838_s24, 128  ;;  %s1155_s16 = scalar_lea.hbm %s1457_s6, 256 }
 0x3ef   : > { %p1152_p11 = scmp.ne.s32.totalorder %s838_s24, %s1151_s25  ;;  %p1156_p0 = scmp.lt.s32.totalorder %s838_s24, %s1457_s6 }
 0x3f0   : > { %p1157_p1 = scmp.lt.s32.totalorder %s1155_s16, %s1151_s25 }
 0x3f1   : > { %p1153_p12 = pnand %p1152_p11, %p1319_p3 }
 0x3f2   : > { %p1158_p2 = por %p1157_p1, %p1156_p0 }
 0x3f3   : > { %p1154_p13 = pneg %p1153_p12 }
 0x3f5   : > { %p1159_p4 = pnand %p1158_p2, %p1154_p13 }
 0x3f7   : > { %1162 = shalt.err (!%p1159_p4)
}
 0x3f8   : > { %1059 = dma.vmem_to_hbm [thread:$0]  (%p1319_p3), %s841_s10, 128, %s838_s24, %s827_s14  }
 0x3f9 PF: > { %p1065_p5 = scmp.ge.s32.totalorder %s1229_s28, 2  ;;  %s852_s23 = sand.u32 1, %s1201_s21  }
 0x3fa   : > { %s853_s26 = scalar_lea.sflag [#allocation4], %s852_s23 }
 0x3fb   : > { %p1062_p6 = pnand %p1065_p5, %p1329_p9 }
 0x3fd   : > { %p1063_p7 = pneg %p1062_p6 }
 0x3ff   : > { %1196 = dma.done.wait (%p1063_p7), %s853_s26, 128  }
 0x400   : > { %1198 = vsyncadd (%p1063_p7), %s853_s26, 4294967168  ;;  %s19_s28 = sadd.s32 1, %s1229_s28   ;;  %s1475_s27 = sld [smem:[#allocation6_spill]] }
 0x401   : > { %p16_p8 = scmp.ge.s32.totalorder %s19_s28, 18   ;;  %s1476_s23 = sld [smem:[#allocation12_spill]] }
 0x402   : > { %s1477_s24 = sld [smem:[#allocation7_spill]]  ;;  %s1481_s21 = smov %s1205_s22 }
 0x403   : > { %s1478_s25 = sld [smem:[#allocation8_spill]] }
 0x404   : > { %s1479_s26 = sld [smem:[#allocation9_spill]] }
 0x405   : > { %s1480_s9 = sld [smem:[#allocation10_spill]] }
 0x406   : > { %s1482_s22 = smov %s1475_s27 }
 0x407   :  { %18 = sbr.rel (!%p16_p8) target bundleno = 5 (0x5), region = 99 }
 0x40b   : > { %s1483_s27 = smov %s1480_s9 }
 0x40c   :  { %858 = vsyncpa [#allocation4], 1 }
 0x40d   :  { %860 = vsyncpa [#allocation4 + $0x1], 1 }

</bundles_post_ra>
